<compile_context>
chip_gen: v6e
topology: v6e:2x2x1
jax: 0.10.0
libtpu: 0.0.40
codegen_flags: <defaults>
</compile_context>

<pallas_src>
import jax
import jax.numpy as jnp
from jax.experimental import pallas as pl
from jax.experimental.pallas import tpu as pltpu

C_IN = 112  # fixed by the module definition (calsim_* expect 112 input channels)


# --------------------------------------------------------------------------- #
# VMEM sizing
# --------------------------------------------------------------------------- #
def _physical_vmem_bytes():
    try:
        info = pltpu.get_tpu_info()
        for name in ("vmem_capacity_bytes", "vmem_bytes", "vmem_size_bytes"):
            v = getattr(info, name, None)
            if v:
                return int(v)
    except Exception:
        pass
    return 64 << 20  # conservative fallback (v7x physical VMEM)


def _budget_and_limit(block_budget_bytes=None):
    phys = _physical_vmem_bytes()
    # Input blocks are double-buffered; outputs/intermediates are ~2% of the
    # input block, so budget ~ phys/6 keeps us comfortably under the limit.
    vmem_limit = min(48 << 20, (phys * 3) // 4)
    if block_budget_bytes is None:
        block_budget_bytes = max(4 << 20, min(12 << 20, phys // 6))
    return block_budget_bytes, vmem_limit


def _pick_batch_tile(b, img_bytes, budget):
    """Largest TB dividing B such that TB images fit the block budget."""
    max_tb = max(1, min(b, budget // max(1, img_bytes)))
    max_tb = min(max_tb, 64)  # amortization saturates; keeps code size sane
    for tb in range(max_tb, 0, -1):
        if b % tb == 0:
            return tb
    return 1


def _pick_tile_rows(h, w, elem_bytes, budget):
    """Row-tile TH (fallback path): TH divides H, TH*W lane-aligned, fits budget."""
    max_rows = max(1, min(h, budget // (C_IN * w * elem_bytes)))
    for th in range(max_rows, 0, -1):
        if h % th == 0 and (th * w) % 128 == 0:
            return th
    return h


# --------------------------------------------------------------------------- #
# Kernels
# --------------------------------------------------------------------------- #
def _make_batch_kernel(h_img, w_img, tb):
    """Batch-folded path: whole image(s) per block, no cross-tile carry."""
    g = h_img * w_img
    n_up = (h_img - 1) * w_img

    def kernel(x_ref, w_ref, b_ref, up_ref, left_ref):
        # x_ref    : (TB, C, G)        f32
        # w_ref    : (8, C)            f32  rows [up_kh0, up_kh1, left_kw0, left_kw1, 0..]
        # b_ref    : (2,)              f32  SMEM [bias_up, bias_left]
        # up_ref   : (TB, 1, (H-1)*W)  f32  (already trimmed to valid rows)
        # left_ref : (TB, 1, H*W)      f32  (column W-1 of every row is wraparound garbage)
        w_b = jnp.broadcast_to(w_ref[...][None, :, :], (tb, 8, C_IN))
        # Batched (8, C) @ (C, G) per image on the MXU.
        s = jnp.einsum("boc,bcg->bog", w_b, x_ref[...],
                       preferred_element_type=jnp.float32)          # (TB, 8, G)
        s0 = s[:, 0:1, :]   # <w_up[:,0,0],   x>
        s1 = s[:, 1:2, :]   # <w_up[:,1,0],   x>
        s2 = s[:, 2:3, :]   # <w_left[:,0,0], x>
        s3 = s[:, 3:4, :]   # <w_left[:,0,1], x>

        # up[r, c] = s0[r, c] + s1[r+1, c] + b_up, rows 0..H-2.
        # Roll s1 left by W (lane g' <- s1[g'+W]); wraparound lanes land in
        # rows >= H-1 which are sliced away by the :n_up trim below.
        s1_dn = pltpu.roll(s1, shift=g - w_img, axis=2)
        up_ref[...] = (s0 + s1_dn + b_ref[0])[:, :, :n_up]

        # left[r, c] = s2[r, c] + s3[r, c+1] + b_left, cols 0..W-2.
        # Wraparound lands only in column W-1, dropped by the wrapper.
        s3_nx = pltpu.roll(s3, shift=g - 1, axis=2)
        left_ref[...] = s2 + s3_nx + b_ref[1]

    return kernel


def _make_rowtile_kernel(w_img):
    """Fallback for large feature maps: row tiles + sequential 1-row carry."""

    def kernel(x_ref, w_ref, b_ref, up_ref, left_ref, carry_ref):
        # x_ref    : (1, C, THW) f32
        # up_ref   : (1, 1, THW) f32  row-shifted up plane (row i holds up row i-1;
        #                             row 0 of each image is garbage, dropped by wrapper)
        # left_ref : (1, 1, THW) f32  (column W-1 garbage, dropped by wrapper)
        # carry_ref: (1, THW)    f32  cross-tile carry of the rolled s0 plane
        t = pl.program_id(1)

        @pl.when(t == 0)
        def _():
            # No uninitialized read / no stale carry across image boundaries.
            carry_ref[...] = jnp.zeros_like(carry_ref)

        s = jnp.dot(w_ref[...], x_ref[0],
                    preferred_element_type=jnp.float32)              # (8, THW)
        thw = s.shape[-1]
        s0, s1, s2, s3 = s[0:1, :], s[1:2, :], s[2:3, :], s[3:4, :]

        # Rolling s0 right by W drops this tile's *last* row into lanes [0, W);
        # those lanes must instead hold the previous tile's last row, which is
        # exactly what the carry scratch contains (requires the t axis to be
        # sequential / "arbitrary").
        s0_rolled = pltpu.roll(s0, shift=w_img, axis=1)
        lane = jax.lax.broadcasted_iota(jnp.int32, (1, thw), 1)
        s0_prev = jnp.where(lane < w_img, carry_ref[...], s0_rolled)
        carry_ref[...] = s0_rolled
        up_ref[0] = s0_prev + s1 + b_ref[0]

        s3_nx = pltpu.roll(s3, shift=thw - 1, axis=1)
        left_ref[0] = s2 + s3_nx + b_ref[1]

    return kernel


# --------------------------------------------------------------------------- #
# Wrapper
# --------------------------------------------------------------------------- #
def efficient_calsim_forward(x_feat_nchw, w_up, b_up, w_left, b_left,
                             block_budget_bytes=None):
    """Pallas implementation of the calsim_up / calsim_left conv heads.

    x_feat_nchw : (B, 112, H, W)  float32 (stand-in for the backbone output)
    w_up        : (1, 112, 2, 1)  float32 PyTorch OIHW conv weight
    b_up        : (1,)            float32
    w_left      : (1, 112, 1, 2)  float32
    b_left      : (1,)            float32
    returns (up, left) with PyTorch shapes (B, 1, H-1, W) and (B, 1, H, W-1).
    """
    B, C, H, W = x_feat_nchw.shape
    assert C == C_IN and H >= 2 and W >= 2

    budget, vmem_limit = _budget_and_limit(block_budget_bytes)

    # Native NCHW consumption, f32 straight from HBM: collapsing the trailing
    # spatial dims is a free reshape (no transpose, no extra HBM pass, no
    # standalone convert pass).
    x_flat = x_feat_nchw.astype(jnp.float32).reshape(B, C, H * W)
    G = H * W
    img_bytes = C_IN * G * 4

    # Pack the 4 channel-weight vectors as rows (lane axis = C), padded to 8
    # rows so the matmul result is sublane-aligned. Constant index_map keeps it
    # VMEM-resident (no per-step re-DMA).
    wmat = jnp.zeros((8, C_IN), jnp.float32)
    wmat = wmat.at[0].set(w_up[0, :, 0, 0].astype(jnp.float32))
    wmat = wmat.at[1].set(w_up[0, :, 1, 0].astype(jnp.float32))
    wmat = wmat.at[2].set(w_left[0, :, 0, 0].astype(jnp.float32))
    wmat = wmat.at[3].set(w_left[0, :, 0, 1].astype(jnp.float32))
    bias = jnp.stack([b_up[0], b_left[0]]).astype(jnp.float32)            # (2,)

    cost = pl.CostEstimate(
        flops=2 * B * G * C_IN * 4,
        transcendentals=0,
        bytes_accessed=B * C_IN * G * 4 + wmat.size * 4 + bias.size * 4
        + 2 * B * G * 4,
    )

    if img_bytes <= budget:
        # -------- batch-folded path (realistic small EfficientNet maps) -------
        tb = _pick_batch_tile(B, img_bytes, budget)
        n_up = (H - 1) * W
        up_raw, left_raw = pl.pallas_call(
            _make_batch_kernel(H, W, tb),
            out_shape=(
                jax.ShapeDtypeStruct((B, 1, n_up), jnp.float32),
                jax.ShapeDtypeStruct((B, 1, G), jnp.float32),
            ),
            grid_spec=pltpu.PrefetchScalarGridSpec(
                num_scalar_prefetch=0,
                grid=(B // tb,),
                in_specs=[
                    pl.BlockSpec((tb, C_IN, G), lambda nb: (nb, 0, 0)),
                    pl.BlockSpec((8, C_IN), lambda nb: (0, 0)),
                    pl.BlockSpec(memory_space=pltpu.MemorySpace.SMEM),
                ],
                out_specs=[
                    pl.BlockSpec((tb, 1, n_up), lambda nb: (nb, 0, 0)),
                    pl.BlockSpec((tb, 1, G), lambda nb: (nb, 0, 0)),
                ],
            ),
            compiler_params=pltpu.CompilerParams(
                dimension_semantics=("parallel",),
                vmem_limit_bytes=vmem_limit),
            cost_estimate=cost,
        )(x_flat, wmat, bias)
        up = up_raw.reshape(B, 1, H - 1, W)                     # free reshape
        left = left_raw.reshape(B, 1, H, W)[:, :, :, : W - 1]   # tiny 1-ch slice
        return up, left

    # -------------- row-tiled fallback (very large feature maps) -------------
    th = _pick_tile_rows(H, W, 4, budget)
    thw = th * W
    nt = H // th
    up_raw, left_raw = pl.pallas_call(
        _make_rowtile_kernel(W),
        out_shape=(
            jax.ShapeDtypeStruct((B, 1, G), jnp.float32),
            jax.ShapeDtypeStruct((B, 1, G), jnp.float32),
        ),
        grid_spec=pltpu.PrefetchScalarGridSpec(
            num_scalar_prefetch=0,
            grid=(B, nt),
            in_specs=[
                pl.BlockSpec((1, C_IN, thw), lambda b, t: (b, 0, t)),
                pl.BlockSpec((8, C_IN), lambda b, t: (0, 0)),
                pl.BlockSpec(memory_space=pltpu.MemorySpace.SMEM),
            ],
            out_specs=[
                pl.BlockSpec((1, 1, thw), lambda b, t: (b, 0, t)),
                pl.BlockSpec((1, 1, thw), lambda b, t: (b, 0, t)),
            ],
            scratch_shapes=[pltpu.VMEM((1, thw), jnp.float32)],
        ),
        compiler_params=pltpu.CompilerParams(
            dimension_semantics=("parallel", "arbitrary"),
            vmem_limit_bytes=vmem_limit),
        cost_estimate=cost,
    )(x_flat, wmat, bias)
    # Undo the in-kernel layout tricks on the tiny 1-channel outputs:
    #   up_raw row i holds up row i-1 -> drop row 0; left column W-1 -> drop it.
    up = up_raw.reshape(B, 1, H, W)[:, :, 1:, :]
    left = left_raw.reshape(B, 1, H, W)[:, :, :, : W - 1]
    return up, left


# --------------------------------------------------------------------------- #
# Reference + test
# --------------------------------------------------------------------------- #
def _reference_forward(x_feat_nchw, w_up, b_up, w_left, b_left):
    """Pure-JAX reference (lax conv) for correctness checking."""
    dn = ("NCHW", "OIHW", "NCHW")
    up = jax.lax.conv_general_dilated(
        x_feat_nchw, w_up, window_strides=(1, 1), padding="VALID",
        dimension_numbers=dn,
        precision=jax.lax.Precision.HIGHEST) + b_up.reshape(1, 1, 1, 1)
    left = jax.lax.conv_general_dilated(
        x_feat_nchw, w_left, window_strides=(1, 1), padding="VALID",
        dimension_numbers=dn,
        precision=jax.lax.Precision.HIGHEST) + b_left.reshape(1, 1, 1, 1)
    return up, left


if __name__ == "__main__":
    key = jax.random.PRNGKey(0)
    k_wu, k_bu, k_wl, k_bl, k_x = jax.random.split(key, 5)

    # Deterministic PyTorch-style init: U(-1/sqrt(fan_in), 1/sqrt(fan_in)),
    # fan_in = 112 * 2 for both heads.
    bound = 1.0 / jnp.sqrt(jnp.float32(C_IN * 2))
    w_up = jax.random.uniform(k_wu, (1, C_IN, 2, 1), jnp.float32, -bound, bound)
    b_up = jax.random.uniform(k_bu, (1,), jnp.float32, -bound, bound)
    w_left = jax.random.uniform(k_wl, (1, C_IN, 1, 2), jnp.float32, -bound, bound)
    b_left = jax.random.uniform(k_bl, (1,), jnp.float32, -bound, bound)

    # Small synthetic feature map standing in for the EfficientNet backbone output.
    B, H, W = 2, 32, 16
    x_feat = jax.random.normal(k_x, (B, C_IN, H, W), jnp.float32)
    img_bytes = C_IN * H * W * 4

    up_ref, left_ref = _reference_forward(x_feat, w_up, b_up, w_left, b_left)

    # (a) auto per-chip budget -> batch-folded path, all images in one block.
    up1, left1 = efficient_calsim_forward(x_feat, w_up, b_up, w_left, b_left)
    # (b) budget = exactly one image -> batch path with TB=1, grid of B steps.
    up2, left2 = efficient_calsim_forward(
        x_feat, w_up, b_up, w_left, b_left, block_budget_bytes=img_bytes)
    # (c) tiny budget -> row-tiled fallback (TH=8, 4 tiles): exercises the carry.
    up3, left3 = efficient_calsim_forward(
        x_feat, w_up, b_up, w_left, b_left,
        block_budget_bytes=C_IN * W * 4 * 8)
    jax.block_until_ready((up1, left1, up2, left2, up3, left3))

    for up, left in ((up1, left1), (up2, left2), (up3, left3)):
        assert up.shape == (B, 1, H - 1, W) and left.shape == (B, 1, H, W - 1)
        # f32 activations/weights (MXU accumulation order differs from the conv).
        assert bool(jnp.allclose(up, up_ref, atol=5e-3, rtol=5e-3))
        assert bool(jnp.allclose(left, left_ref, atol=5e-3, rtol=5e-3))

    print("KERNEL_OK")
</pallas_src>

<mosaic_0001>
module attributes {stable_mosaic.version = 11 : i64} {
  func.func @kernel(%arg0: i32, %arg1: memref<2x112x512xf32, #tpu.memory_space<vmem>>, %arg2: memref<8x112xf32, #tpu.memory_space<vmem>>, %arg3: memref<2xf32, #tpu.memory_space<smem>>, %arg4: memref<2x1x496xf32, #tpu.memory_space<vmem>>, %arg5: memref<2x1x512xf32, #tpu.memory_space<vmem>>) attributes {dimension_semantics = [#tpu.dimension_semantics<parallel>], iteration_bounds = array<i64: 1>, scalar_prefetch = 0 : i64, scratch_operands = 0 : i64, tpu.core_type = #tpu.core_type<tc>, window_params = [{transform_indices = @transform_0, window_bounds = array<i64: 2, 112, 512>}, {pipeline_mode = #tpu.pipeline_mode<synchronous>, transform_indices = @transform_1, window_bounds = array<i64: 8, 112>}, {transform_indices = @transform_2, window_bounds = array<i64: 2>}, {transform_indices = @transform_3, window_bounds = array<i64: 2, 1, 496>}, {transform_indices = @transform_4, window_bounds = array<i64: 2, 1, 512>}]} {
    %c0 = arith.constant 0 : index
    %c0_0 = arith.constant 0 : index
    %0 = vector.load %arg2[%c0, %c0_0] : memref<8x112xf32, #tpu.memory_space<vmem>>, vector<8x112xf32>
    %1 = vector.shape_cast %0 : vector<8x112xf32> to vector<1x8x112xf32>
    %2 = vector.shape_cast %1 : vector<1x8x112xf32> to vector<1x8x112xf32>
    %3 = vector.broadcast %2 : vector<1x8x112xf32> to vector<2x8x112xf32>
    %c0_1 = arith.constant 0 : index
    %c0_2 = arith.constant 0 : index
    %c0_3 = arith.constant 0 : index
    %4 = vector.load %arg1[%c0_1, %c0_2, %c0_3] : memref<2x112x512xf32, #tpu.memory_space<vmem>>, vector<2x112x512xf32>
    "tpu.trace_start"() <{level = 10 : i32, message = "boc,bcg->bog"}> : () -> ()
    %cst = arith.constant dense<0.000000e+00> : vector<2x8x512xf32>
    %5 = tpu.matmul %3, %4, %cst {dimension_numbers = #tpu.dot_dimension_numbers<[2], [1], [1], [2], [0, 0, 0, 1, 1, 2], [0], [0]>} : vector<2x8x112xf32>, vector<2x112x512xf32>, vector<2x8x512xf32> -> vector<2x8x512xf32>
    "tpu.trace_stop"() : () -> ()
    %6 = vector.extract_strided_slice %5 {offsets = [0, 0, 0], sizes = [2, 1, 512], strides = [1, 1, 1]} : vector<2x8x512xf32> to vector<2x1x512xf32>
    %7 = vector.extract_strided_slice %5 {offsets = [0, 1, 0], sizes = [2, 1, 512], strides = [1, 1, 1]} : vector<2x8x512xf32> to vector<2x1x512xf32>
    %8 = vector.extract_strided_slice %5 {offsets = [0, 2, 0], sizes = [2, 1, 512], strides = [1, 1, 1]} : vector<2x8x512xf32> to vector<2x1x512xf32>
    %9 = vector.extract_strided_slice %5 {offsets = [0, 3, 0], sizes = [2, 1, 512], strides = [1, 1, 1]} : vector<2x8x512xf32> to vector<2x1x512xf32>
    %c496_i32 = arith.constant 496 : i32
    %10 = tpu.dynamic_rotate %7 by %c496_i32 dim 2 : vector<2x1x512xf32>, i32 -> vector<2x1x512xf32>
    %11 = arith.addf %6, %10 : vector<2x1x512xf32>
    %c0_4 = arith.constant 0 : index
    %12 = memref.load %arg3[%c0_4] : memref<2xf32, #tpu.memory_space<smem>>
    %13 = vector.broadcast %12 : f32 to vector<2x1x512xf32>
    %14 = arith.addf %11, %13 : vector<2x1x512xf32>
    %15 = vector.extract_strided_slice %14 {offsets = [0, 0, 0], sizes = [2, 1, 496], strides = [1, 1, 1]} : vector<2x1x512xf32> to vector<2x1x496xf32>
    %c0_5 = arith.constant 0 : index
    %c0_6 = arith.constant 0 : index
    %c0_7 = arith.constant 0 : index
    %16 = vector.load %arg4[%c0_5, %c0_6, %c0_7] : memref<2x1x496xf32, #tpu.memory_space<vmem>>, vector<2x1x496xf32>
    tpu.vector_store %arg4[%c0_5, %c0_6, %c0_7], %15 {strides = array<i32>} : memref<2x1x496xf32, #tpu.memory_space<vmem>>, vector<2x1x496xf32>,
    %c511_i32 = arith.constant 511 : i32
    %17 = tpu.dynamic_rotate %9 by %c511_i32 dim 2 : vector<2x1x512xf32>, i32 -> vector<2x1x512xf32>
    %18 = arith.addf %8, %17 : vector<2x1x512xf32>
    %c1 = arith.constant 1 : index
    %19 = memref.load %arg3[%c1] : memref<2xf32, #tpu.memory_space<smem>>
    %20 = vector.broadcast %19 : f32 to vector<2x1x512xf32>
    %21 = arith.addf %18, %20 : vector<2x1x512xf32>
    %c0_8 = arith.constant 0 : index
    %c0_9 = arith.constant 0 : index
    %c0_10 = arith.constant 0 : index
    %22 = vector.load %arg5[%c0_8, %c0_9, %c0_10] : memref<2x1x512xf32, #tpu.memory_space<vmem>>, vector<2x1x512xf32>
    tpu.vector_store %arg5[%c0_8, %c0_9, %c0_10], %21 {strides = array<i32>} : memref<2x1x512xf32, #tpu.memory_space<vmem>>, vector<2x1x512xf32>,
    return
  }
  func.func @transform_0(%arg0: i32) -> (i32, i32, i32) {
    %c0_i32 = arith.constant 0 : i32
    %c0_i32_0 = arith.constant 0 : i32
    %c0_i32_1 = arith.constant 0 : i32
    return %arg0, %c0_i32, %c0_i32_0 : i32, i32, i32
  }
  func.func @transform_1(%arg0: i32) -> (i32, i32) {
    %c0_i32 = arith.constant 0 : i32
    %c0_i32_0 = arith.constant 0 : i32
    %c0_i32_1 = arith.constant 0 : i32
    return %c0_i32, %c0_i32_0 : i32, i32
  }
  func.func @transform_2(%arg0: i32) -> i32 {
    %c0_i32 = arith.constant 0 : i32
    %c0_i32_0 = arith.constant 0 : i32
    return %c0_i32 : i32
  }
  func.func @transform_3(%arg0: i32) -> (i32, i32, i32) {
    %c0_i32 = arith.constant 0 : i32
    %c0_i32_0 = arith.constant 0 : i32
    %c0_i32_1 = arith.constant 0 : i32
    return %arg0, %c0_i32, %c0_i32_0 : i32, i32, i32
  }
  func.func @transform_4(%arg0: i32) -> (i32, i32, i32) {
    %c0_i32 = arith.constant 0 : i32
    %c0_i32_0 = arith.constant 0 : i32
    %c0_i32_1 = arith.constant 0 : i32
    return %arg0, %c0_i32, %c0_i32_0 : i32, i32, i32
  }
}

</mosaic_0001>

<bundles_post_ra>
// kernel: tpu_custom_call.1
= control target key start
LH: loop header
LB: loop body
LE: loop exit
PB: predicated region body
PF: predicated region fallthrough
CT: control target
= control target key end

     0   :  { %10 = vsyncpa [#allocation3], 0  ;;  %s1096_s0 = inlined_call_operand.hbm [shape: f32[2,112,512], index: 0, kind: input, shape index: {}]   ;;  %s1097_s1 = inlined_call_operand.hbm [shape: f32[8,112], index: 1, kind: input, shape index: {}]   ;;  %s1098_s2 = inlined_call_operand.vmem [shape: f32[2], index: 2, kind: input, shape index: {}]   ;;  %s1099_s3 = inlined_call_operand.hbm [shape: f32[2,1,496], index: 3, kind: output, shape index: {0}]   ;;  %s1100_s4 = inlined_call_operand.hbm [shape: f32[2,1,512], index: 4, kind: output, shape index: {1}]  }
   0x1   :  { %11 = vsyncpa [#allocation7], 0 }
   0x2   :  { %12 = vsyncpa [#allocation5], 0 }
   0x3   :  { %13 = vsyncpa [#allocation4], 0 }
   0x4   :  { %14 = vsyncpa [#allocation11], 0  ;;  %s893_s15 = smov [#allocation2]  }
   0x5   :  { %s20_s16 = sshll.u32 %s893_s15, 4  ;;  %s21_s16 = int_to_ptr.vmem [resolvable:$true] %s20_s16 }
   0x6   :  { %s799_s17 = scalar_lea.vmem %s21_s16, 14336  ;;  %p804_p1 = scmp.lt.s32.totalorder %s21_s16, %s21_s16 }
   0x7   :  { %p800_p0 = scmp.ne.s32.totalorder %s21_s16, %s799_s17  ;;  %p805_p2 = scmp.lt.s32.totalorder %s799_s17, %s799_s17 }
   0x9   :  { %p806_p3 = por %p805_p2, %p804_p1 }
   0xb   :  { %p807_p4 = pnand %p806_p3, %p800_p0 }
   0xd   :  { %810 = shalt.err (!%p807_p4)
}
   0xe   :  { %s894_s18 = smov 512   ;;  %s895_s19 = smov 32  }
   0xf   :  { %26 = dma.hbm_to_vmem [thread:$0]  %s1096_s0, 14336, %s21_s16, [#allocation3], %s894_s18, %s894_s18, %s895_s19  }
  0x10   :  { %s896_s22 = smov [#allocation6]   ;;  %s43_s26 = sshll.u32 %s1098_s2, 4  ;;  %s44_s26 = int_to_ptr.vmem [resolvable:$true] %s43_s26 }
  0x11   :  { %s33_s23 = sshll.u32 %s896_s22, 4  ;;  %s34_s23 = int_to_ptr.vmem [resolvable:$true] %s33_s23 }
  0x12   :  { %s819_s27 = scalar_lea.vmem %s34_s23, 128  ;;  %p824_p6 = scmp.lt.s32.totalorder %s34_s23, %s34_s23 }
  0x13   :  { %p820_p5 = scmp.ne.s32.totalorder %s34_s23, %s819_s27  ;;  %p825_p7 = scmp.lt.s32.totalorder %s819_s27, %s819_s27 }
  0x15   :  { %p826_p8 = por %p825_p7, %p824_p6 }
  0x17   :  { %p827_p9 = pnand %p826_p8, %p820_p5 }
  0x19   :  { %830 = shalt.err (!%p827_p9)
}
  0x1a   :  { %36 = dma.hbm_to_vmem [thread:$0]  %s1097_s1, 128, %s34_s23, [#allocation7]  }
  0x1b   :  { %s831_s0 = scalar_lea.vmem %s44_s26, 16  ;;  %p836_p11 = scmp.lt.s32.totalorder %s44_s26, %s44_s26 }
  0x1c   :  { %p832_p10 = scmp.ne.s32.totalorder %s44_s26, %s831_s0  ;;  %p837_p12 = scmp.lt.s32.totalorder %s831_s0, %s831_s0 }
  0x1e   :  { %p838_p13 = por %p837_p12, %p836_p11 }
  0x20   :  { %p839_p0 = pnand %p838_p13, %p832_p10 }
  0x22   :  { %842 = shalt.err (!%p839_p0)
}
  0x23   :  { %s897_s2 = smov [#allocation8]  }
  0x24   :  { %46 = dma.vmem_to_smem %s44_s26, 16, %s897_s2, [#allocation5]  }
  0x25   :  { %883 = dma.done.wait [#allocation3], 14336  }
  0x26   :  { %884 = vsyncadd [#allocation3], 4294952960 }
  0x27   :  { %885 = dma.done.wait [#allocation7], 128  }
  0x28   :  { %886 = vsyncadd [#allocation7], 4294967168 }
  0x29   :  { %887 = dma.done.wait [#allocation5], 16  }
  0x2a   :  { %888 = vsyncadd [#allocation5], 4294967280 }
  0x2b   :  { %56 = sfence }
  0x2c   :  { %v111_v0 = vld [vmem:[#allocation2 + $0x1a8] sm:$0xff]  ;;  %v113_v1 = vld [vmem:[#allocation2 + $0x1b8] sm:$0xff]  ;;  %v110_v2 = vld [vmem:[#allocation2 + $0x1a0] sm:$0xff]  ;;  %vm170_vm0 = vcmask 916480   ;;  %v898_v57 = vmov 0.0   ;;  %s899_s1 = smov 127  }
  0x2d   :  { %178 = vmatprep.subr.mxu0 %v111_v0  ;;  %249 = vmatprep.subr.mxu1 %v113_v1  ;;  %v112_v3 = vld [vmem:[#allocation2 + $0x1b0] sm:$0xff]  ;;  %v107_v4 = vld [vmem:[#allocation2 + $0x188] sm:$0xff]  ;;  %v109_v5 = vld [vmem:[#allocation2 + $0x198] sm:$0xff]  ;;  %s900_s30 = smov 112   ;;  %s777_s5 = sld [smem:[#allocation8 + $0x1]] }
  0x2e   :  { %179 = vmatpush1.msra.mxu0 %v110_v2  ;;  %250 = vmatpush1.msra.mxu1 %v112_v3  ;;  %v106_v6 = vld [vmem:[#allocation2 + $0x180] sm:$0xff]  ;;  %v108_v7 = vld [vmem:[#allocation2 + $0x190] sm:$0xff]  ;;  %v103_v8 = vld [vmem:[#allocation2 + $0x168] sm:$0xff]  ;;  %s517_s6 = sld [smem:[#allocation8]]  ;;  %s902_s7 = smov [#allocation10]  }
  0x2f   :  { %180 = vmatprep.subr.mxu0 %v107_v4  ;;  %251 = vmatprep.subr.mxu1 %v109_v5  ;;  %v105_v9 = vld [vmem:[#allocation2 + $0x178] sm:$0xff]  ;;  %v102_v10 = vld [vmem:[#allocation2 + $0x160] sm:$0xff]  ;;  %v104_v11 = vld [vmem:[#allocation2 + $0x170] sm:$0xff]  ;;  %s755_s8 = sshll.u32 %s902_s7, 4  ;;  %s903_s9 = smov [#allocation9]   ;;  %s756_s8 = int_to_ptr.vmem [resolvable:$true] %s755_s8 }
  0x30   :  { %181 = vmatpush1.msra.mxu0 %v106_v6  ;;  %252 = vmatpush1.msra.mxu1 %v108_v7  ;;  %v99_v12 = vld [vmem:[#allocation2 + $0x148] sm:$0xff]  ;;  %v101_v13 = vld [vmem:[#allocation2 + $0x158] sm:$0xff]  ;;  %v98_v14 = vld [vmem:[#allocation2 + $0x140] sm:$0xff]  ;;  %s743_s10 = sshll.u32 %s903_s9, 4  ;;  %s843_s11 = scalar_lea.vmem %s756_s8, 128  ;;  %s744_s10 = int_to_ptr.vmem [resolvable:$true] %s743_s10 }
  0x31   :  { %182 = vmatprep.subr.mxu0 %v103_v8  ;;  %253 = vmatprep.subr.mxu1 %v105_v9  ;;  %v100_v15 = vld [vmem:[#allocation2 + $0x150] sm:$0xff]  ;;  %v95_v16 = vld [vmem:[#allocation2 + $0x128] sm:$0xff]  ;;  %v97_v17 = vld [vmem:[#allocation2 + $0x138] sm:$0xff]  ;;  %p844_p1 = scmp.ne.s32.totalorder %s756_s8, %s843_s11  ;;  %p848_p2 = scmp.lt.s32.totalorder %s756_s8, %s756_s8 }
  0x32   :  { %183 = vmatpush1.msra.mxu0 %v102_v10  ;;  %254 = vmatpush1.msra.mxu1 %v104_v11  ;;  %v94_v18 = vld [vmem:[#allocation2 + $0x120] sm:$0xff]  ;;  %v96_v19 = vld [vmem:[#allocation2 + $0x130] sm:$0xff]  ;;  %v91_v20 = vld [vmem:[#allocation2 + $0x108] sm:$0xff]  ;;  %p849_p3 = scmp.lt.s32.totalorder %s843_s11, %s843_s11 }
  0x33   :  { %184 = vmatprep.subr.mxu0 %v99_v12  ;;  %255 = vmatprep.subr.mxu1 %v101_v13  ;;  %v93_v21 = vld [vmem:[#allocation2 + $0x118] sm:$0xff]  ;;  %v90_v22 = vld [vmem:[#allocation2 + $0x100] sm:$0xff]  ;;  %v92_v23 = vld [vmem:[#allocation2 + $0x110] sm:$0xff] }
  0x34   :  { %185 = vmatpush1.msra.mxu0 %v98_v14  ;;  %256 = vmatpush1.msra.mxu1 %v100_v15  ;;  %v87_v24 = vld [vmem:[#allocation2 + $0xe8] sm:$0xff]  ;;  %v89_v25 = vld [vmem:[#allocation2 + $0xf8] sm:$0xff]  ;;  %v86_v26 = vld [vmem:[#allocation2 + $0xe0] sm:$0xff]  ;;  %p850_p4 = por %p849_p3, %p848_p2 }
  0x35   :  { %186 = vmatprep.subr.mxu0 %v95_v16  ;;  %257 = vmatprep.subr.mxu1 %v97_v17  ;;  %v88_v27 = vld [vmem:[#allocation2 + $0xf0] sm:$0xff]  ;;  %v83_v28 = vld [vmem:[#allocation2 + $0xc8] sm:$0xff]  ;;  %v85_v29 = vld [vmem:[#allocation2 + $0xd8] sm:$0xff] }
  0x36   :  { %187 = vmatpush1.msra.mxu0 %v94_v18  ;;  %258 = vmatpush1.msra.mxu1 %v96_v19  ;;  %v82_v30 = vld [vmem:[#allocation2 + $0xc0] sm:$0xff]  ;;  %v84_v31 = vld [vmem:[#allocation2 + $0xd0] sm:$0xff]  ;;  %v79_v32 = vld [vmem:[#allocation2 + $0xa8] sm:$0xff]  ;;  %p851_p5 = pnand %p850_p4, %p844_p1 }
  0x37   :  { %188 = vmatprep.subr.mxu0 %v91_v20  ;;  %259 = vmatprep.subr.mxu1 %v93_v21  ;;  %v81_v33 = vld [vmem:[#allocation2 + $0xb8] sm:$0xff]  ;;  %v78_v34 = vld [vmem:[#allocation2 + $0xa0] sm:$0xff]  ;;  %v80_v35 = vld [vmem:[#allocation2 + $0xb0] sm:$0xff] }
  0x38   :  { %189 = vmatpush1.msra.mxu0 %v90_v22  ;;  %260 = vmatpush1.msra.mxu1 %v92_v23  ;;  %v75_v36 = vld [vmem:[#allocation2 + $0x88] sm:$0xff]  ;;  %v77_v37 = vld [vmem:[#allocation2 + $0x98] sm:$0xff]  ;;  %v74_v38 = vld [vmem:[#allocation2 + $0x80] sm:$0xff] }
  0x39   :  { %190 = vmatprep.subr.mxu0 %v87_v24  ;;  %261 = vmatprep.subr.mxu1 %v89_v25  ;;  %v76_v39 = vld [vmem:[#allocation2 + $0x90] sm:$0xff]  ;;  %v71_v40 = vld [vmem:[#allocation2 + $0x68] sm:$0xff]  ;;  %v73_v41 = vld [vmem:[#allocation2 + $0x78] sm:$0xff] }
  0x3a   :  { %191 = vmatpush1.msra.mxu0 %v86_v26  ;;  %262 = vmatpush1.msra.mxu1 %v88_v27  ;;  %v70_v42 = vld [vmem:[#allocation2 + $0x60] sm:$0xff]  ;;  %v72_v43 = vld [vmem:[#allocation2 + $0x70] sm:$0xff]  ;;  %v67_v44 = vld [vmem:[#allocation2 + $0x48] sm:$0xff] }
  0x3b   :  { %192 = vmatprep.subr.mxu0 %v83_v28  ;;  %263 = vmatprep.subr.mxu1 %v85_v29  ;;  %v69_v45 = vld [vmem:[#allocation2 + $0x58] sm:$0xff]  ;;  %v66_v46 = vld [vmem:[#allocation2 + $0x40] sm:$0xff]  ;;  %v68_v47 = vld [vmem:[#allocation2 + $0x50] sm:$0xff] }
  0x3c   :  { %193 = vmatpush1.msra.mxu0 %v82_v30  ;;  %264 = vmatpush1.msra.mxu1 %v84_v31  ;;  %v63_v48 = vld [vmem:[#allocation2 + $0x28] sm:$0xff]  ;;  %v65_v49 = vld [vmem:[#allocation2 + $0x38] sm:$0xff]  ;;  %v62_v50 = vld [vmem:[#allocation2 + $0x20] sm:$0xff] }
  0x3d   :  { %194 = vmatprep.subr.mxu0 %v79_v32  ;;  %265 = vmatprep.subr.mxu1 %v81_v33  ;;  %v64_v51 = vld [vmem:[#allocation2 + $0x30] sm:$0xff]  ;;  %v59_v52 = vld [vmem:[#allocation2 + $0x8] sm:$0xff]  ;;  %v61_v53 = vld [vmem:[#allocation2 + $0x18] sm:$0xff] }
  0x3e   :  { %195 = vmatpush1.msra.mxu0 %v78_v34  ;;  %266 = vmatpush1.msra.mxu1 %v80_v35  ;;  %v58_v54 = vld [vmem:[#allocation2] sm:$0xff]  ;;  %v60_v55 = vld [vmem:[#allocation2 + $0x10] sm:$0xff]  ;;  %v167_v58 = vld [vmem:[#allocation2 + $0x368] sm:$0xff] }
  0x3f   :  { %196 = vmatprep.subr.mxu0 %v75_v36  ;;  %267 = vmatprep.subr.mxu1 %v77_v37  ;;  %v940_v56 = vld [vmem:[#allocation6] sm:$0xff]  ;;  %v169_v59 = vld [vmem:[#allocation2 + $0x378] sm:$0xff]  ;;  %v168_v61 = vld [vmem:[#allocation2 + $0x370] sm:$0xff] }
  0x40   :  { %197 = vmatpush1.msra.mxu0 %v74_v38  ;;  %268 = vmatpush1.msra.mxu1 %v76_v39  ;;  %v166_v60 = vld [vmem:[#allocation2 + $0x360] sm:$0xff]  ;;  %v163_v62 = vld [vmem:[#allocation2 + $0x348] sm:$0xff]  ;;  %v165_v63 = vld [vmem:[#allocation2 + $0x358] sm:$0xff] }
  0x41   :  { %198 = vmatprep.subr.mxu0 %v71_v40  ;;  %269 = vmatprep.subr.mxu1 %v73_v41  ;;  %v162_v0 = vld [vmem:[#allocation2 + $0x340] sm:$0xff]  ;;  %v164_v1 = vld [vmem:[#allocation2 + $0x350] sm:$0xff]  ;;  %v159_v2 = vld [vmem:[#allocation2 + $0x328] sm:$0xff] }
  0x42   :  { %199 = vmatpush1.msra.mxu0 %v70_v42  ;;  %270 = vmatpush1.msra.mxu1 %v72_v43  ;;  %v161_v3 = vld [vmem:[#allocation2 + $0x338] sm:$0xff]  ;;  %v158_v4 = vld [vmem:[#allocation2 + $0x320] sm:$0xff]  ;;  %v160_v5 = vld [vmem:[#allocation2 + $0x330] sm:$0xff] }
  0x43   :  { %200 = vmatprep.subr.mxu0 %v67_v44  ;;  %271 = vmatprep.subr.mxu1 %v69_v45  ;;  %v155_v6 = vld [vmem:[#allocation2 + $0x308] sm:$0xff]  ;;  %v157_v7 = vld [vmem:[#allocation2 + $0x318] sm:$0xff]  ;;  %v154_v8 = vld [vmem:[#allocation2 + $0x300] sm:$0xff] }
  0x44   :  { %201 = vmatpush1.msra.mxu0 %v66_v46  ;;  %272 = vmatpush1.msra.mxu1 %v68_v47  ;;  %v156_v9 = vld [vmem:[#allocation2 + $0x310] sm:$0xff]  ;;  %v151_v10 = vld [vmem:[#allocation2 + $0x2e8] sm:$0xff]  ;;  %v153_v11 = vld [vmem:[#allocation2 + $0x2f8] sm:$0xff] }
  0x45   :  { %202 = vmatprep.subr.mxu0 %v63_v48  ;;  %273 = vmatprep.subr.mxu1 %v65_v49  ;;  %v150_v12 = vld [vmem:[#allocation2 + $0x2e0] sm:$0xff]  ;;  %v152_v13 = vld [vmem:[#allocation2 + $0x2f0] sm:$0xff]  ;;  %v147_v14 = vld [vmem:[#allocation2 + $0x2c8] sm:$0xff] }
  0x46   :  { %203 = vmatpush1.msra.mxu0 %v62_v50  ;;  %274 = vmatpush1.msra.mxu1 %v64_v51  ;;  %v149_v15 = vld [vmem:[#allocation2 + $0x2d8] sm:$0xff]  ;;  %v146_v16 = vld [vmem:[#allocation2 + $0x2c0] sm:$0xff]  ;;  %v148_v17 = vld [vmem:[#allocation2 + $0x2d0] sm:$0xff] }
  0x47   :  { %204 = vmatprep.subr.mxu0 %v59_v52  ;;  %275 = vmatprep.subr.mxu1 %v61_v53  ;;  %v143_v18 = vld [vmem:[#allocation2 + $0x2a8] sm:$0xff]  ;;  %v145_v19 = vld [vmem:[#allocation2 + $0x2b8] sm:$0xff]  ;;  %v142_v20 = vld [vmem:[#allocation2 + $0x2a0] sm:$0xff] }
  0x48   :  { %205 = vmatpush1.msra.mxu0 %v58_v54  ;;  %238 = vmatprep.mubr.f32.mxu0 %v898_v57  ;;  %v144_v21 = vld [vmem:[#allocation2 + $0x2b0] sm:$0xff]  ;;  %v139_v22 = vld [vmem:[#allocation2 + $0x288] sm:$0xff]  ;;  %v141_v23 = vld [vmem:[#allocation2 + $0x298] sm:$0xff] }
  0x49   :  { %276 = vmatpush1.msra.mxu1 %v60_v55  ;;  %309 = vmatprep.mubr.f32.mxu1 %v898_v57  ;;  %v138_v24 = vld [vmem:[#allocation2 + $0x280] sm:$0xff]  ;;  %v140_v25 = vld [vmem:[#allocation2 + $0x290] sm:$0xff]  ;;  %v135_v26 = vld [vmem:[#allocation2 + $0x268] sm:$0xff] }
  0x4a   :  { %773 = vmatmul.mubr.msk.f32.vlgmr.msra.gmra.mxu0 %vm170_vm0, %v940_v56  ;;  %774 = vmatmul.mubr.msk.f32.vlgmr.msra.gmra.mxu1 %vm170_vm0, %v940_v56  ;;  %v137_v27 = vld [vmem:[#allocation2 + $0x278] sm:$0xff]  ;;  %v134_v28 = vld [vmem:[#allocation2 + $0x260] sm:$0xff]  ;;  %v136_v29 = vld [vmem:[#allocation2 + $0x270] sm:$0xff] }
  0x4b   :  { %320 = vmatprep.subr.mxu0 %v167_v58  ;;  %391 = vmatprep.subr.mxu1 %v169_v59  ;;  %v131_v30 = vld [vmem:[#allocation2 + $0x248] sm:$0xff]  ;;  %v133_v31 = vld [vmem:[#allocation2 + $0x258] sm:$0xff]  ;;  %v130_v32 = vld [vmem:[#allocation2 + $0x240] sm:$0xff] }
  0x4c   :  { %321 = vmatpush1.msra.mxu0 %v166_v60  ;;  %392 = vmatpush1.msra.mxu1 %v168_v61  ;;  %v132_v33 = vld [vmem:[#allocation2 + $0x250] sm:$0xff]  ;;  %v127_v34 = vld [vmem:[#allocation2 + $0x228] sm:$0xff]  ;;  %v129_v35 = vld [vmem:[#allocation2 + $0x238] sm:$0xff] }
  0x4d   :  { %322 = vmatprep.subr.mxu0 %v163_v62  ;;  %393 = vmatprep.subr.mxu1 %v165_v63  ;;  %v126_v36 = vld [vmem:[#allocation2 + $0x220] sm:$0xff]  ;;  %v128_v37 = vld [vmem:[#allocation2 + $0x230] sm:$0xff]  ;;  %v123_v38 = vld [vmem:[#allocation2 + $0x208] sm:$0xff] }
  0x4e   :  { %323 = vmatpush1.msra.mxu0 %v162_v0  ;;  %394 = vmatpush1.msra.mxu1 %v164_v1  ;;  %v125_v39 = vld [vmem:[#allocation2 + $0x218] sm:$0xff]  ;;  %v122_v40 = vld [vmem:[#allocation2 + $0x200] sm:$0xff]  ;;  %v124_v41 = vld [vmem:[#allocation2 + $0x210] sm:$0xff] }
  0x4f   :  { %324 = vmatprep.subr.mxu0 %v159_v2  ;;  %395 = vmatprep.subr.mxu1 %v161_v3  ;;  %v119_v42 = vld [vmem:[#allocation2 + $0x1e8] sm:$0xff]  ;;  %v121_v43 = vld [vmem:[#allocation2 + $0x1f8] sm:$0xff]  ;;  %v118_v44 = vld [vmem:[#allocation2 + $0x1e0] sm:$0xff] }
  0x50   :  { %325 = vmatpush1.msra.mxu0 %v158_v4  ;;  %396 = vmatpush1.msra.mxu1 %v160_v5  ;;  %v120_v45 = vld [vmem:[#allocation2 + $0x1f0] sm:$0xff]  ;;  %v115_v46 = vld [vmem:[#allocation2 + $0x1c8] sm:$0xff]  ;;  %v117_v47 = vld [vmem:[#allocation2 + $0x1d8] sm:$0xff] }
  0x51   :  { %326 = vmatprep.subr.mxu0 %v155_v6  ;;  %397 = vmatprep.subr.mxu1 %v157_v7  ;;  %v114_v48 = vld [vmem:[#allocation2 + $0x1c0] sm:$0xff]  ;;  %v116_v49 = vld [vmem:[#allocation2 + $0x1d0] sm:$0xff] }
  0x52   :  { %327 = vmatpush1.msra.mxu0 %v154_v8  ;;  %398 = vmatpush1.msra.mxu1 %v156_v9 }
  0x53   :  { %328 = vmatprep.subr.mxu0 %v151_v10  ;;  %399 = vmatprep.subr.mxu1 %v153_v11  ;;  %v498_v10 = vlaneseq }
  0x54   :  { %329 = vmatpush1.msra.mxu0 %v150_v12  ;;  %400 = vmatpush1.msra.mxu1 %v152_v13 }
  0x55   :  { %330 = vmatprep.subr.mxu0 %v147_v14  ;;  %401 = vmatprep.subr.mxu1 %v149_v15  ;;  %v995_v12 = vand.u32 127, %v498_v10  ;;  %vm1030_vm3 = vcmp.lt.s32.totalorder %v498_v10, 512  ;;  %vm1049_vm4 = vcmp.lt.s32.totalorder %v498_v10, 496 }
  0x56   :  { %331 = vmatpush1.msra.mxu0 %v146_v16  ;;  %402 = vmatpush1.msra.mxu1 %v148_v17 }
  0x57   :  { %332 = vmatprep.subr.mxu0 %v143_v18  ;;  %403 = vmatprep.subr.mxu1 %v145_v19  ;;  %vm623_vm1 = vcmp.lt.s32.totalorder %v995_v12, 127  ;;  %vm500_vm2 = vcmp.lt.s32.totalorder %v995_v12, 112 }
  0x58   :  { %333 = vmatpush1.msra.mxu0 %v142_v20  ;;  %404 = vmatpush1.msra.mxu1 %v144_v21  ;;  %v901_v21 = vmov 1966171168  }
  0x59   :  { %334 = vmatprep.subr.mxu0 %v139_v22  ;;  %405 = vmatprep.subr.mxu1 %v141_v23  ;;  %v538_v22 = vunpack.c.l.s4 %v901_v21 }
  0x5a   :  { %335 = vmatpush1.msra.mxu0 %v138_v24  ;;  %406 = vmatpush1.msra.mxu1 %v140_v25 }
  0x5b   :  { %336 = vmatprep.subr.mxu0 %v135_v26  ;;  %407 = vmatprep.subr.mxu1 %v137_v27  ;;  %v541_v26 = vshrl.u32 %v498_v10, 7  ;;  %v1005_v27 = vstv %s777_s5 }
  0x5c   :  { %337 = vmatpush1.msra.mxu0 %v134_v28  ;;  %408 = vmatpush1.msra.mxu1 %v136_v29 }
  0x5d   :  { %338 = vmatprep.subr.mxu0 %v131_v30  ;;  %409 = vmatprep.subr.mxu1 %v133_v31  ;;  %v539_v30 = vunpack.c.0.s8 %v538_v22 }
  0x5e   :  { %339 = vmatpush1.msra.mxu0 %v130_v32  ;;  %410 = vmatpush1.msra.mxu1 %v132_v33 }
  0x5f   :  { %340 = vmatprep.subr.mxu0 %v127_v34  ;;  %411 = vmatprep.subr.mxu1 %v129_v35 }
  0x60   :  { %341 = vmatpush1.msra.mxu0 %v126_v36  ;;  %412 = vmatpush1.msra.mxu1 %v128_v37  ;;  %v1015_v37 = vsub.s32 %v539_v30, %v541_v26 }
  0x61   :  { %342 = vmatprep.subr.mxu0 %v123_v38  ;;  %413 = vmatprep.subr.mxu1 %v125_v39 }
  0x62   :  { %343 = vmatpush1.msra.mxu0 %v122_v40  ;;  %414 = vmatpush1.msra.mxu1 %v124_v41 }
  0x63   :  { %344 = vmatprep.subr.mxu0 %v119_v42  ;;  %415 = vmatprep.subr.mxu1 %v121_v43 }
  0x64   :  { %345 = vmatpush1.msra.mxu0 %v118_v44  ;;  %416 = vmatpush1.msra.mxu1 %v120_v45 }
  0x65   :  { %346 = vmatprep.subr.mxu0 %v115_v46  ;;  %417 = vmatprep.subr.mxu1 %v117_v47 }
  0x66   :  { %347 = vmatpush1.msra.mxu0 %v114_v48  ;;  %380 = vmatprep.mubr.f32.mxu0 %v898_v57 }
  0x67   :  { %418 = vmatpush1.msra.mxu1 %v116_v49  ;;  %451 = vmatprep.mubr.f32.mxu1 %v898_v57 }
  0x68   :  { %775 = vmatmul.mubr.msk.f32.vlgmr.msra.gmra.mxu0 %vm170_vm0, %v940_v56  ;;  %776 = vmatmul.mubr.msk.f32.vlgmr.msra.gmra.mxu1 %vm170_vm0, %v940_v56 }
 0x10a   :  { %v954_v50 = vpop.f32.mrf.mxu0  ;;  %v957_v52 = vpop.f32.mrf.mxu1 }
 0x10b   :  { %v591_v51 = vrot.slane %v954_v50, 3  ;;  %v593_v55 = vrot.slane %v957_v52, 3  ;;  %v466_v56 = vrot.slane %v954_v50, 1  ;;  %v468_v57 = vrot.slane %v957_v52, 1 }
 0x10c   :  { %v959_v53 = vpop.f32.mrf.mxu0  ;;  %v968_v58 = vpop.f32.mrf.mxu1 }
 0x10d   :  { %607 = vrot.lane.b32.xlu0 %v591_v51, %s899_s1  ;;  %v592_v54 = vrot.slane %v959_v53, 3  ;;  %v594_v59 = vrot.slane %v968_v58, 3  ;;  %v467_v60 = vrot.slane %v959_v53, 1  ;;  %v469_v2 = vrot.slane %v968_v58, 1 }
 0x10f   :  { %611 = vrot.lane.b32.xlu1 %v592_v54, %s899_s1 }
 0x111   :  { %615 = vrot.lane.b32.xlu0 %v593_v55, %s899_s1 }
 0x115   :  { %482 = vrot.lane.b32.xlu0 %v466_v56, %s900_s30  ;;  %v518_v56 = vstv %s517_s6 }
 0x119   :  { %490 = vrot.lane.b32.xlu0 %v468_v57, %s900_s30 }
 0x11d   :  { %619 = vrot.lane.b32.xlu0 %v594_v59, %s899_s1 }
 0x121   :  { %486 = vrot.lane.b32.xlu0 %v467_v60, %s900_s30 }
 0x128   :  { %v973_v61 = vpop.f32.mrf.mxu0  ;;  %v975_v62 = vpop.f32.mrf.mxu1 }
 0x129   :  { %v597_v63 = vrot.slane %v975_v62, 3  ;;  %v595_v0 = vrot.slane %v973_v61, 3  ;;  %v470_v1 = vrot.slane %v973_v61, 1  ;;  %v472_v3 = vrot.slane %v975_v62, 1 }
 0x12a   :  { %v984_v4 = vpop.f32.mrf.mxu0  ;;  %v987_v6 = vpop.f32.mrf.mxu1 }
 0x12b   :  { %617 = vrot.lane.b32.xlu1 %v597_v63, %s899_s1  ;;  %609 = vrot.lane.b32.xlu0 %v595_v0, %s899_s1  ;;  %v596_v5 = vrot.slane %v984_v4, 3  ;;  %v598_v7 = vrot.slane %v987_v6, 3  ;;  %v471_v8 = vrot.slane %v984_v4, 1  ;;  %v473_v9 = vrot.slane %v987_v6, 1 }
 0x12f   :  { %494 = vrot.lane.b32.xlu0 %v469_v2, %s900_s30  ;;  %484 = vrot.lane.b32.xlu1 %v470_v1, %s900_s30 }
 0x133   :  { %492 = vrot.lane.b32.xlu1 %v472_v3, %s900_s30 }
 0x137   :  { %613 = vrot.lane.b32.xlu1 %v596_v5, %s899_s1 }
 0x13b   :  { %621 = vrot.lane.b32.xlu1 %v598_v7, %s899_s1 }
 0x13f   :  { %488 = vrot.lane.b32.xlu1 %v471_v8, %s900_s30 }
 0x143   :  { %496 = vrot.lane.b32.xlu1 %v473_v9, %s900_s30 }
 0x17f   :  { %v608_v11 = vpop.permute.xlu0 %607 }
 0x181   :  { %v612_v14 = vpop.permute.xlu1 %611 }
 0x182   :  { %v628_v17 = vsel %vm623_vm1, %v608_v11, %v612_v14 }
 0x183   :  { %v616_v13 = vpop.permute.xlu0 %615  ;;  %v640_v19 = vrot.slane %v628_v17, 6 }
 0x184   :  { %v626_v15 = vsel %vm623_vm1, %v612_v14, %v616_v13 }
 0x185   :  { %v641_v18 = vrot.slane %v626_v15, 6  ;;  %v656_v24 = vadd.f32 %v640_v19, %v954_v50 }
 0x187   :  { %v483_v16 = vpop.permute.xlu0 %482  ;;  %v657_v23 = vadd.f32 %v641_v18, %v959_v53  ;;  %v666_v34 = vadd.f32 %v1005_v27, %v656_v24 }
 0x189   :  { %v667_v31 = vadd.f32 %v1005_v27, %v657_v23 }
 0x18b   :  { %v491_v20 = vpop.permute.xlu0 %490  ;;  %v682_v38 = vcombine.low %v666_v34, %v667_v31 }
 0x18d   :  { %v690_v43 = vrot.slane %v682_v38, %v1015_v37 }
 0x18f   :  { %v620_v25 = vpop.permute.xlu0 %619 }
 0x190   :  { %v624_v28 = vsel %vm623_vm1, %v616_v13, %v620_v25  ;;  %v630_v29 = vsel %vm623_vm1, %v620_v25, %v608_v11 }
 0x191   :  { %v642_v32 = vrot.slane %v624_v28, 6  ;;  %v643_v33 = vrot.slane %v630_v29, 6 }
 0x193   :  { %v658_v35 = vadd.f32 %v642_v32, %v957_v52  ;;  %v659_v36 = vadd.f32 %v643_v33, %v968_v58  ;;  %v487_v42 = vpop.permute.xlu0 %486 }
 0x194   :  { %v503_v45 = vsel %vm500_vm2, %v487_v42, %v491_v20  ;;  %v505_v46 = vsel %vm500_vm2, %v483_v16, %v487_v42 }
 0x195   :  { %v668_v39 = vadd.f32 %v1005_v27, %v658_v35  ;;  %v669_v40 = vadd.f32 %v1005_v27, %v659_v36  ;;  %v509_v48 = vadd.f32 %v505_v46, %v954_v50  ;;  %v510_v49 = vadd.f32 %v503_v45, %v959_v53 }
 0x197   :  { %v683_v41 = vcombine.low %v668_v39, %v669_v40  ;;  %v519_v60 = vadd.f32 %v518_v56, %v509_v48  ;;  %v520_v63 = vadd.f32 %v518_v56, %v510_v49 }
 0x199   :  { %v697_v44 = vrot.slane %v683_v41, %v1015_v37  ;;  %v535_v5 = vcombine.low %v519_v60, %v520_v63 }
 0x19b   :  { %v698_v47 = vcombine.low %v690_v43, %v697_v44  ;;  %v543_v13 = vrot.slane %v535_v5, %v1015_v37 }
 0x19d   :  { %v618_v51 = vpop.permute.xlu1 %617  ;;  %v610_v54 = vpop.permute.xlu0 %609  ;;  %v705_v55 = vrot.slane %v698_v47, %v1015_v37 }
 0x19f   :  { %v706_v59 = vcombine.high %v705_v55, %v705_v55 }
 0x1a1   :  { %v495_v0 = vpop.permute.xlu0 %494  ;;  %v485_v1 = vpop.permute.xlu1 %484  ;;  %736 = vst.msk [vmem:[#allocation10] sm:$0xf] %vm1030_vm3, %v706_v59 }
 0x1a2   :  { %v501_v50 = vsel %vm500_vm2, %v491_v20, %v495_v0  ;;  %v507_v53 = vsel %vm500_vm2, %v495_v0, %v483_v16 }
 0x1a3   :  { %v511_v2 = vadd.f32 %v501_v50, %v957_v52  ;;  %v512_v3 = vadd.f32 %v507_v53, %v968_v58 }
 0x1a5   :  { %v521_v7 = vadd.f32 %v518_v56, %v511_v2  ;;  %v522_v8 = vadd.f32 %v518_v56, %v512_v3  ;;  %v493_v9 = vpop.permute.xlu1 %492 }
 0x1a7   :  { %v536_v11 = vcombine.low %v521_v7, %v522_v8 }
 0x1a9   :  { %v550_v14 = vrot.slane %v536_v11, %v1015_v37  ;;  %v614_v15 = vpop.permute.xlu1 %613 }
 0x1aa   :  { %v627_v17 = vsel %vm623_vm1, %v614_v15, %v618_v51  ;;  %v629_v16 = vsel %vm623_vm1, %v610_v54, %v614_v15 }
 0x1ab   :  { %v644_v18 = vrot.slane %v629_v16, 6  ;;  %v645_v52 = vrot.slane %v627_v17, 6  ;;  %v551_v19 = vcombine.low %v543_v13, %v550_v14 }
 0x1ad   :  { %v660_v20 = vadd.f32 %v644_v18, %v973_v61  ;;  %v661_v21 = vadd.f32 %v645_v52, %v984_v4  ;;  %v622_v22 = vpop.permute.xlu1 %621  ;;  %v558_v23 = vrot.slane %v551_v19, %v1015_v37 }
 0x1ae   :  { %v625_v24 = vsel %vm623_vm1, %v618_v51, %v622_v22  ;;  %v631_v25 = vsel %vm623_vm1, %v622_v22, %v610_v54 }
 0x1af   :  { %v670_v26 = vadd.f32 %v1005_v27, %v660_v20  ;;  %v671_v10 = vadd.f32 %v1005_v27, %v661_v21  ;;  %v646_v28 = vrot.slane %v625_v24, 6  ;;  %v647_v29 = vrot.slane %v631_v25, 6  ;;  %589 = vst.msk [vmem:[#allocation9] sm:$0xf] %vm1049_vm4, %v558_v23 }
 0x1b1   :  { %v662_v30 = vadd.f32 %v646_v28, %v975_v62  ;;  %v663_v31 = vadd.f32 %v647_v29, %v987_v6  ;;  %v489_v32 = vpop.permute.xlu1 %488  ;;  %v707_v35 = vcombine.low %v670_v26, %v671_v10 }
 0x1b2   :  { %v504_v33 = vsel %vm500_vm2, %v489_v32, %v493_v9  ;;  %v506_v34 = vsel %vm500_vm2, %v485_v1, %v489_v32 }
 0x1b3   :  { %v672_v36 = vadd.f32 %v1005_v27, %v662_v30  ;;  %v673_v38 = vadd.f32 %v1005_v27, %v663_v31  ;;  %v513_v39 = vadd.f32 %v506_v34, %v973_v61  ;;  %v514_v40 = vadd.f32 %v504_v33, %v984_v4 }
 0x1b4   :  { %v715_v47 = vrot.slane %v707_v35, %v1015_v37 }
 0x1b5   :  { %v708_v41 = vcombine.low %v672_v36, %v673_v38  ;;  %v523_v42 = vadd.f32 %v518_v56, %v513_v39  ;;  %v497_v43 = vpop.permute.xlu1 %496  ;;  %v524_v44 = vadd.f32 %v518_v56, %v514_v40 }
 0x1b6   :  { %v502_v45 = vsel %vm500_vm2, %v493_v9, %v497_v43  ;;  %v508_v46 = vsel %vm500_vm2, %v497_v43, %v485_v1 }
 0x1b7   :  { %v722_v48 = vrot.slane %v708_v41, %v1015_v37  ;;  %v515_v27 = vadd.f32 %v502_v45, %v975_v62  ;;  %v516_v61 = vadd.f32 %v508_v46, %v987_v6  ;;  %v559_v49 = vcombine.low %v523_v42, %v524_v44 }
 0x1b9   :  { %v525_v4 = vadd.f32 %v518_v56, %v515_v27  ;;  %v526_v51 = vadd.f32 %v518_v56, %v516_v61  ;;  %v723_v54 = vcombine.low %v715_v47, %v722_v48  ;;  %v567_v12 = vrot.slane %v559_v49, %v1015_v37 }
 0x1bb   :  { %v560_v55 = vcombine.low %v525_v4, %v526_v51  ;;  %v730_v59 = vrot.slane %v723_v54, %v1015_v37 }
 0x1bd   :  { %v574_v60 = vrot.slane %v560_v55, %v1015_v37  ;;  %v731_v63 = vcombine.high %v730_v59, %v730_v59 }
 0x1bf   :  { %v575_v62 = vcombine.low %v567_v12, %v574_v60  ;;  %737 = vst.msk [vmem:[#allocation10 + $0x4] sm:$0xf] %vm1030_vm3, %v731_v63 }
 0x1c0   :  { %854 = shalt.err (!%p851_p5)
}
 0x1c1   :  { %s904_s12 = smov 64   ;;  %s905_s13 = smov 4   ;;  %v582_v6 = vrot.slane %v575_v62, %v1015_v37 }
 0x1c2   :  { %761 = dma.vmem_to_hbm [thread:$0]  %s756_s8, 128, %s1100_s4, [#allocation11], %s904_s12, %s904_s12, %s905_s13  }
 0x1c3   :  { %590 = vst.msk [vmem:[#allocation9 + $0x4] sm:$0xf] %vm1049_vm4, %v582_v6  ;;  %s863_s16 = scalar_lea.vmem %s744_s10, 128  ;;  %p868_p7 = scmp.lt.s32.totalorder %s744_s10, %s744_s10 }
 0x1c4   :  { %p864_p6 = scmp.ne.s32.totalorder %s744_s10, %s863_s16  ;;  %p869_p8 = scmp.lt.s32.totalorder %s863_s16, %s863_s16 }
 0x1c6   :  { %p870_p9 = por %p869_p8, %p868_p7 }
 0x1c8   :  { %p871_p10 = pnand %p870_p9, %p864_p6 }
 0x1ca   :  { %874 = shalt.err (!%p871_p10)
}
 0x1cb   :  { %749 = dma.vmem_to_hbm [thread:$0]  %s744_s10, 128, %s1099_s3, [#allocation4], %s904_s12, %s904_s12, %s905_s13  }
 0x1cc   :  { %889 = dma.done.wait [#allocation4], 128  }
 0x1cd   :  { %890 = vsyncadd [#allocation4], 4294967168 }
 0x1ce   :  { %891 = dma.done.wait [#allocation11], 128  }
 0x1cf   :  { %892 = vsyncadd [#allocation11], 4294967168 }
 0x1d0   :  { %768 = vsyncpa [#allocation3], 1 }
 0x1d1   :  { %769 = vsyncpa [#allocation7], 1 }
 0x1d2   :  { %770 = vsyncpa [#allocation4], 1 }
 0x1d3   :  { %771 = vsyncpa [#allocation11], 1 }
 0x1d4   :  { %772 = vsyncpa [#allocation5], 1 }

</bundles_post_ra>
